<compile_context>
chip_gen: v7x
topology: tpu7x:2x2x1
jax: 0.10.0
libtpu: 0.0.40
codegen_flags: <defaults>
</compile_context>

<pallas_src>
import functools

import jax
import jax.numpy as jnp
from jax.experimental import pallas as pl
from jax.experimental.pallas import tpu as pltpu

_LANES = 128
_SUBLANES = 8


def _round_up(a, b):
    return -(-a // b) * b


def _softmax_kernel(x_ref, o_ref, *, k, c, chunk):
    """Softmax over groups of `c` lanes; `k` groups per packed row.

    x_ref / o_ref: (tile_rows, k * c). Each group of `c` lanes holds one
    original row of the [N, C] input, so reductions run per lane group only
    (rows are never mixed).
    """
    tile_rows = x_ref.shape[0]
    n_chunks = tile_rows // chunk        # static Python int
    for g in range(k):                   # static, small (k = 128 // C when packed)
        lane0 = g * c
        for j in range(n_chunks):        # static; keeps live values ~(chunk, c)
            r0 = j * chunk
            x = x_ref[pl.ds(r0, chunk), pl.ds(lane0, c)].astype(jnp.float32)
            m = jnp.max(x, axis=-1, keepdims=True)
            e = jnp.exp(x - m)
            s = jnp.sum(e, axis=-1, keepdims=True)
            # Exact reciprocal keeps bit-level agreement with jax.nn.softmax;
            # switch to approx=True (EUP vrcp) if a looser tolerance is OK.
            y = e * pl.reciprocal(s, approx=False)
            o_ref[pl.ds(r0, chunk), pl.ds(lane0, c)] = y.astype(o_ref.dtype)


def classifier_forward(x, *, target_block_bytes=1 << 20, max_chunk_rows=256):
    """Softmax over axis 1 of a [N, C] array, computed with a Pallas TPU kernel."""
    N, C = x.shape
    if N == 0 or C == 0:
        return x

    # --- lane packing: put k = 128 // C rows per 128-lane row when possible ---
    if C < _LANES and _LANES % C == 0:
        k = _LANES // C
    else:
        k = 1  # C >= 128 or C does not divide 128: keep rows as-is (full C per block).
    # TODO(synk): for very wide C (row >> VMEM budget) add a second grid axis over C
    # with an online (running max / denominator) softmax instead of shrinking rows.

    n_padded = _round_up(N, k)
    if n_padded != N:
        x = jnp.pad(x, ((0, n_padded - N), (0, 0)))
    packed_rows = n_padded // k
    width = k * C
    xp = x.reshape(packed_rows, width)   # free row-major reshape in XLA

    # --- tile sizing: ~target_block_bytes per block, multiple of the chunk ---
    bytes_per_row = width * x.dtype.itemsize
    chunk = min(max_chunk_rows, _round_up(packed_rows, _SUBLANES))
    chunk = max(
        _SUBLANES,
        min(chunk, (target_block_bytes // bytes_per_row) // _SUBLANES * _SUBLANES),
    )
    n_chunks = max(1, target_block_bytes // (bytes_per_row * chunk))
    n_chunks = min(n_chunks, _round_up(packed_rows, chunk) // chunk)
    tile = n_chunks * chunk
    rows_padded = _round_up(packed_rows, tile)
    if rows_padded != packed_rows:
        xp = jnp.pad(xp, ((0, rows_padded - packed_rows), (0, 0)))

    out_packed = pl.pallas_call(
        functools.partial(_softmax_kernel, k=k, c=C, chunk=chunk),
        out_shape=jax.ShapeDtypeStruct((rows_padded, width), x.dtype),
        grid=(rows_padded // tile,),
        in_specs=[pl.BlockSpec((tile, width), lambda i: (i, 0))],
        out_specs=pl.BlockSpec((tile, width), lambda i: (i, 0)),
        compiler_params=pltpu.CompilerParams(
            # Rows are independent: parallel lets v7x split the grid across TCs.
            dimension_semantics=("parallel",),
            # Blocks are ~1 MiB; double-buffered in+out is ~4 MiB. Explicit,
            # generation-safe scoped-VMEM limit (<= defaults everywhere).
            vmem_limit_bytes=32 * 1024 * 1024,
        ),
    )(xp)

    out = out_packed[:packed_rows].reshape(n_padded, C)[:N]
    return out


if __name__ == "__main__":
    key = jax.random.PRNGKey(0)
    k1, k2 = jax.random.split(key)

    # Small shape consistent with the module's classifier head: N nodes x C classes.
    x = jax.random.normal(k1, (8, 32), dtype=jnp.float32)
    out = jax.block_until_ready(classifier_forward(x))
    ref = jax.nn.softmax(x, axis=1)
    assert out.shape == x.shape
    assert jnp.allclose(out, ref, atol=1e-6), "mismatch vs reference softmax (packed path)"

    # Exercise the unpacked / padded fallback (C does not divide 128, ragged N).
    x2 = jax.random.normal(k2, (13, 48), dtype=jnp.float32)
    out2 = jax.block_until_ready(classifier_forward(x2))
    ref2 = jax.nn.softmax(x2, axis=1)
    assert out2.shape == x2.shape
    assert jnp.allclose(out2, ref2, atol=1e-6), "mismatch vs reference softmax (fallback path)"

    print("KERNEL_OK")
</pallas_src>

<mosaic_0001>
module attributes {stable_mosaic.version = 11 : i64} {
  func.func @_softmax_kernel(%arg0: i32, %arg1: memref<8x128xf32, #tpu.memory_space<vmem>>, %arg2: memref<8x128xf32, #tpu.memory_space<vmem>>) attributes {dimension_semantics = [#tpu.dimension_semantics<parallel>], iteration_bounds = array<i64: 1>, scalar_prefetch = 0 : i64, scratch_operands = 0 : i64, tpu.core_type = #tpu.core_type<tc>, window_params = [{transform_indices = @transform_0, window_bounds = array<i64: 8, 128>}, {transform_indices = @transform_1, window_bounds = array<i64: 8, 128>}]} {
    %c0 = arith.constant 0 : index
    %c0_0 = arith.constant 0 : index
    %0 = vector.load %arg1[%c0, %c0_0] : memref<8x128xf32, #tpu.memory_space<vmem>>, vector<8x32xf32>
    %cst = arith.constant dense<0xFF800000> : vector<8xf32>
    %1 = vector.multi_reduction <maximumf>, %0, %cst [1] : vector<8x32xf32> to vector<8xf32>
    %2 = vector.shape_cast %1 : vector<8xf32> to vector<8x1xf32>
    %3 = vector.broadcast %2 : vector<8x1xf32> to vector<8x32xf32>
    %4 = arith.subf %0, %3 : vector<8x32xf32>
    %5 = math.exp %4 : vector<8x32xf32>
    %cst_1 = arith.constant dense<0.000000e+00> : vector<8xf32>
    %6 = vector.multi_reduction <add>, %5, %cst_1 [1] : vector<8x32xf32> to vector<8xf32>
    %7 = vector.shape_cast %6 : vector<8xf32> to vector<8x1xf32>
    %8 = tpu.reciprocal %7 : vector<8x1xf32> -> vector<8x1xf32>
    %9 = vector.broadcast %8 : vector<8x1xf32> to vector<8x32xf32>
    %10 = arith.mulf %5, %9 : vector<8x32xf32>
    %c0_2 = arith.constant 0 : index
    %c0_3 = arith.constant 0 : index
    %11 = vector.load %arg2[%c0_2, %c0_3] : memref<8x128xf32, #tpu.memory_space<vmem>>, vector<8x32xf32>
    tpu.vector_store %arg2[%c0_2, %c0_3], %10 {strides = array<i32>} : memref<8x128xf32, #tpu.memory_space<vmem>>, vector<8x32xf32>,
    %c0_4 = arith.constant 0 : index
    %c32 = arith.constant 32 : index
    %12 = vector.load %arg1[%c0_4, %c32] : memref<8x128xf32, #tpu.memory_space<vmem>>, vector<8x32xf32>
    %cst_5 = arith.constant dense<0xFF800000> : vector<8xf32>
    %13 = vector.multi_reduction <maximumf>, %12, %cst_5 [1] : vector<8x32xf32> to vector<8xf32>
    %14 = vector.shape_cast %13 : vector<8xf32> to vector<8x1xf32>
    %15 = vector.broadcast %14 : vector<8x1xf32> to vector<8x32xf32>
    %16 = arith.subf %12, %15 : vector<8x32xf32>
    %17 = math.exp %16 : vector<8x32xf32>
    %cst_6 = arith.constant dense<0.000000e+00> : vector<8xf32>
    %18 = vector.multi_reduction <add>, %17, %cst_6 [1] : vector<8x32xf32> to vector<8xf32>
    %19 = vector.shape_cast %18 : vector<8xf32> to vector<8x1xf32>
    %20 = tpu.reciprocal %19 : vector<8x1xf32> -> vector<8x1xf32>
    %21 = vector.broadcast %20 : vector<8x1xf32> to vector<8x32xf32>
    %22 = arith.mulf %17, %21 : vector<8x32xf32>
    %c0_7 = arith.constant 0 : index
    %c32_8 = arith.constant 32 : index
    %23 = vector.load %arg2[%c0_7, %c32_8] : memref<8x128xf32, #tpu.memory_space<vmem>>, vector<8x32xf32>
    tpu.vector_store %arg2[%c0_7, %c32_8], %22 {strides = array<i32>} : memref<8x128xf32, #tpu.memory_space<vmem>>, vector<8x32xf32>,
    %c0_9 = arith.constant 0 : index
    %c64 = arith.constant 64 : index
    %24 = vector.load %arg1[%c0_9, %c64] : memref<8x128xf32, #tpu.memory_space<vmem>>, vector<8x32xf32>
    %cst_10 = arith.constant dense<0xFF800000> : vector<8xf32>
    %25 = vector.multi_reduction <maximumf>, %24, %cst_10 [1] : vector<8x32xf32> to vector<8xf32>
    %26 = vector.shape_cast %25 : vector<8xf32> to vector<8x1xf32>
    %27 = vector.broadcast %26 : vector<8x1xf32> to vector<8x32xf32>
    %28 = arith.subf %24, %27 : vector<8x32xf32>
    %29 = math.exp %28 : vector<8x32xf32>
    %cst_11 = arith.constant dense<0.000000e+00> : vector<8xf32>
    %30 = vector.multi_reduction <add>, %29, %cst_11 [1] : vector<8x32xf32> to vector<8xf32>
    %31 = vector.shape_cast %30 : vector<8xf32> to vector<8x1xf32>
    %32 = tpu.reciprocal %31 : vector<8x1xf32> -> vector<8x1xf32>
    %33 = vector.broadcast %32 : vector<8x1xf32> to vector<8x32xf32>
    %34 = arith.mulf %29, %33 : vector<8x32xf32>
    %c0_12 = arith.constant 0 : index
    %c64_13 = arith.constant 64 : index
    %35 = vector.load %arg2[%c0_12, %c64_13] : memref<8x128xf32, #tpu.memory_space<vmem>>, vector<8x32xf32>
    tpu.vector_store %arg2[%c0_12, %c64_13], %34 {strides = array<i32>} : memref<8x128xf32, #tpu.memory_space<vmem>>, vector<8x32xf32>,
    %c0_14 = arith.constant 0 : index
    %c96 = arith.constant 96 : index
    %36 = vector.load %arg1[%c0_14, %c96] : memref<8x128xf32, #tpu.memory_space<vmem>>, vector<8x32xf32>
    %cst_15 = arith.constant dense<0xFF800000> : vector<8xf32>
    %37 = vector.multi_reduction <maximumf>, %36, %cst_15 [1] : vector<8x32xf32> to vector<8xf32>
    %38 = vector.shape_cast %37 : vector<8xf32> to vector<8x1xf32>
    %39 = vector.broadcast %38 : vector<8x1xf32> to vector<8x32xf32>
    %40 = arith.subf %36, %39 : vector<8x32xf32>
    %41 = math.exp %40 : vector<8x32xf32>
    %cst_16 = arith.constant dense<0.000000e+00> : vector<8xf32>
    %42 = vector.multi_reduction <add>, %41, %cst_16 [1] : vector<8x32xf32> to vector<8xf32>
    %43 = vector.shape_cast %42 : vector<8xf32> to vector<8x1xf32>
    %44 = tpu.reciprocal %43 : vector<8x1xf32> -> vector<8x1xf32>
    %45 = vector.broadcast %44 : vector<8x1xf32> to vector<8x32xf32>
    %46 = arith.mulf %41, %45 : vector<8x32xf32>
    %c0_17 = arith.constant 0 : index
    %c96_18 = arith.constant 96 : index
    %47 = vector.load %arg2[%c0_17, %c96_18] : memref<8x128xf32, #tpu.memory_space<vmem>>, vector<8x32xf32>
    tpu.vector_store %arg2[%c0_17, %c96_18], %46 {strides = array<i32>} : memref<8x128xf32, #tpu.memory_space<vmem>>, vector<8x32xf32>,
    return
  }
  func.func @transform_0(%arg0: i32) -> (i32, i32) {
    %c0_i32 = arith.constant 0 : i32
    %c0_i32_0 = arith.constant 0 : i32
    return %arg0, %c0_i32 : i32, i32
  }
  func.func @transform_1(%arg0: i32) -> (i32, i32) {
    %c0_i32 = arith.constant 0 : i32
    %c0_i32_0 = arith.constant 0 : i32
    return %arg0, %c0_i32 : i32, i32
  }
}

</mosaic_0001>

<bundles_post_ra>
// kernel: tpu_custom_call.1
= control target key start
LH: loop header
LB: loop body
LE: loop exit
PB: predicated region body
PF: predicated region fallthrough
CT: control target
= control target key end

     0   :  { %6 = vsyncpa [#allocation3], 0  ;;  %s224_s0 = inlined_call_operand.hbm [shape: f32[8,128], index: 0, kind: input, shape index: {}]   ;;  %s225_s1 = inlined_call_operand.hbm [shape: f32[8,128], index: 1, kind: output, shape index: {}]  }
   0x1   :  { %7 = vsyncpa [#allocation4], 0  ;;  %s173_s6 = smov [#allocation2]   ;;  %s125_s10 = scalar_lea.hbm %s224_s0, 128 }
   0x2   :  { %s14_s7 = sshll.u32 %s173_s6, 4  ;;  %p126_p0 = scmp.ne.s32.totalorder %s224_s0, %s125_s10  ;;  %s15_s7 = int_to_ptr.vmem [resolvable:$true] %s14_s7 }
   0x3   :  { %p129_p1 = scmp.lt.u32.totalorder %s125_s10, %s224_s0 }
   0x5   :  { %p131_p2 = pnand %p129_p1, %p126_p0 }
   0x7   :  { %134 = shalt.err (!%p131_p2)
}
   0x8   :  { %s135_s15 = scalar_lea.vmem %s15_s7, 128  ;;  %p140_p4 = scmp.lt.s32.totalorder %s15_s7, %s15_s7 }
   0x9   :  { %p136_p3 = scmp.ne.s32.totalorder %s15_s7, %s135_s15  ;;  %p141_p5 = scmp.lt.s32.totalorder %s135_s15, %s135_s15 }
   0xb   :  { %p142_p6 = por %p141_p5, %p140_p4 }
   0xd   :  { %p143_p7 = pnand %p142_p6, %p136_p3 }
   0xf   :  { %146 = shalt.err (!%p143_p7)
}
  0x10   :  { %17 = dma.hbm_to_vmem [thread:$0]  %s224_s0, 128, %s15_s7, [#allocation3]  }
  0x11   :  { %169 = dma.done.wait [#allocation3], 128  }
  0x12   :  { %170 = vsyncadd [#allocation3], 4294967168  ;;  %vm36_vm0 = vcmask 523520   ;;  %vm72_vm1 = vcmask 1048320   ;;  %v35_v0 = vld [vmem:[#allocation2] sm:$0xff]  ;;  %vm54_vm2 = vcmask 785920  }
  0x13   :  { %vm22_vm3 = vcmask 261120   ;;  %v37_v1 = vsel %vm36_vm0, %v35_v0, -inf  ;;  %v73_v2 = vsel %vm72_vm1, %v35_v0, -inf  ;;  %v55_v3 = vsel %vm54_vm2, %v35_v0, -inf  ;;  %s174_s0 = smov 96   ;;  %s175_s18 = smov 64  }
  0x14   :  { %38 = vmax.xlane.f32.xlu0 %v37_v1  ;;  %74 = vmax.xlane.f32.xlu1 %v73_v2  ;;  %v23_v4 = vsel %vm22_vm3, %v35_v0, -inf  ;;  %s176_s19 = smov 32   ;;  %s177_s20 = smov [#allocation5]  }
  0x15   :  { %s95_s21 = sshll.u32 %s177_s20, 4  ;;  %s96_s21 = int_to_ptr.vmem [resolvable:$true] %s95_s21 }
  0x16   :  { %s147_s22 = scalar_lea.vmem %s96_s21, 128  ;;  %p152_p9 = scmp.lt.s32.totalorder %s96_s21, %s96_s21 }
  0x17   :  { %p148_p8 = scmp.ne.s32.totalorder %s96_s21, %s147_s22  ;;  %p153_p10 = scmp.lt.s32.totalorder %s147_s22, %s147_s22 }
  0x18   :  { %56 = vmax.xlane.f32.xlu0 %v55_v3  ;;  %24 = vmax.xlane.f32.xlu1 %v23_v4 }
  0x19   :  { %p154_p11 = por %p153_p10, %p152_p9 }
  0x1b   :  { %p155_p12 = pnand %p154_p11, %p148_p8 }
  0xa1   :  { %v39_v5 = vpop.xlane.xlu0 %38  ;;  %v75_v6 = vpop.xlane.xlu1 %74 }
  0xa2   :  { %v40_v7 = vsub.f32 %v35_v0, %v39_v5  ;;  %v76_v9 = vsub.f32 %v35_v0, %v75_v6 }
  0xa4   :  { %v41_v8 = vmul.f32 1.442695, %v40_v7  ;;  %v77_v13 = vmul.f32 1.442695, %v76_v9 }
  0xa5   :  { %v57_v10 = vpop.xlane.xlu0 %56  ;;  %v25_v17 = vpop.xlane.xlu1 %24 }
  0xa6   :  { %109 = vpow2.f32 %v41_v8  ;;  %v58_v11 = vsub.f32 %v35_v0, %v57_v10  ;;  %v26_v18 = vsub.f32 %v35_v0, %v25_v17 }
  0xa8   :  { %v59_v12 = vmul.f32 1.442695, %v58_v11  ;;  %v27_v19 = vmul.f32 1.442695, %v26_v18 }
  0xaa   :  { %111 = vpow2.f32 %v59_v12 }
  0xab   :  { %113 = vpow2.f32 %v77_v13 }
  0xac   :  { %115 = vpow2.f32 %v27_v19 }
  0xb0   :  { %v110_v14 = vpop.eup %109 }
  0xb1   :  { %44 = vrot.lane.b32.xlu0 %v110_v14, %s174_s0 }
  0xb4   :  { %v112_v15 = vpop.eup %111 }
  0xb5   :  { %62 = vrot.lane.b32.xlu1 %v112_v15, %s175_s18  ;;  %v114_v16 = vpop.eup %113 }
  0xb6   :  { %v116_v20 = vpop.eup %115 }
  0xb7   :  { %v29_v21 = vsel %vm22_vm3, %v116_v20, 0.0 }
  0xb9   :  { %80 = vrot.lane.b32.xlu1 %v114_v16, %s176_s19 }
  0xdd   :  { %30 = vadd.xlane.f32.xlu1 %v29_v21 }
 0x123   :  { %v45_v22 = vpop.permute.xlu0 %44 }
 0x124   :  { %v47_v23 = vsel %vm22_vm3, %v45_v22, 0.0 }
 0x125   :  { %48 = vadd.xlane.f32.xlu0 %v47_v23 }
 0x127   :  { %v63_v24 = vpop.permute.xlu1 %62 }
 0x128   :  { %v65_v25 = vsel %vm22_vm3, %v63_v24, 0.0 }
 0x129   :  { %66 = vadd.xlane.f32.xlu0 %v65_v25 }
 0x12b   :  { %v81_v26 = vpop.permute.xlu1 %80 }
 0x12c   :  { %v83_v27 = vsel %vm22_vm3, %v81_v26, 0.0 }
 0x12d   :  { %84 = vadd.xlane.f32.xlu0 %v83_v27 }
 0x16a   :  { %v31_v28 = vpop.xlane.xlu1 %30 }
 0x16b   :  { %117 = vrcp.f32 %v31_v28 }
 0x175   :  { %v118_v29 = vpop.eup %117 }
 0x176   :  { %v33_v30 = vmul.f32 %v118_v29, %v116_v20 }
 0x178   :  { %34 = vst.msk [vmem:[#allocation5] sm:$0xff] %vm22_vm3, %v33_v30 }
 0x1b2   :  { %v49_v31 = vpop.xlane.xlu0 %48 }
 0x1b3   :  { %119 = vrcp.f32 %v49_v31 }
 0x1b6   :  { %v67_v32 = vpop.xlane.xlu0 %66 }
 0x1b7   :  { %121 = vrcp.f32 %v67_v32 }
 0x1ba   :  { %v85_v33 = vpop.xlane.xlu0 %84 }
 0x1bb   :  { %123 = vrcp.f32 %v85_v33 }
 0x1bd   :  { %v120_v34 = vpop.eup %119 }
 0x1be   :  { %v51_v35 = vmul.f32 %v120_v34, %v110_v14 }
 0x1c0   :  { %52 = vst.msk [vmem:[#allocation5] sm:$0xff] %vm36_vm0, %v51_v35 }
 0x1c1   :  { %v122_v36 = vpop.eup %121 }
 0x1c2   :  { %v69_v37 = vmul.f32 %v122_v36, %v112_v15 }
 0x1c4   :  { %70 = vst.msk [vmem:[#allocation5] sm:$0xff] %vm54_vm2, %v69_v37 }
 0x1c5   :  { %v124_v38 = vpop.eup %123 }
 0x1c6   :  { %v87_v39 = vmul.f32 %v124_v38, %v114_v16 }
 0x1c8   :  { %88 = vst.msk [vmem:[#allocation5] sm:$0xff] %vm72_vm1, %v87_v39 }
 0x1c9   :  { %158 = shalt.err (!%p155_p12)
}
 0x1ca   :  { %s159_s25 = scalar_lea.hbm %s225_s1, 128 }
 0x1cb   :  { %p160_p13 = scmp.ne.s32.totalorder %s225_s1, %s159_s25  ;;  %p163_p0 = scmp.lt.u32.totalorder %s159_s25, %s225_s1 }
 0x1cd   :  { %p165_p1 = pnand %p163_p0, %p160_p13 }
 0x1cf   :  { %168 = shalt.err (!%p165_p1)
}
 0x1d0   :  { %98 = dma.vmem_to_hbm [thread:$0]  %s96_s21, 128, %s225_s1, [#allocation4]  }
 0x1d1   :  { %171 = dma.done.wait [#allocation4], 128  }
 0x1d2   :  { %172 = vsyncadd [#allocation4], 4294967168 }
 0x1d3   :  { %102 = vsyncpa [#allocation3], 1 }
 0x1d4   :  { %103 = vsyncpa [#allocation4], 1 }

</bundles_post_ra>
